<compile_context>
chip_gen: v5e
topology: v5e:2x2
jax: 0.10.0
libtpu: 0.0.40
codegen_flags: <defaults>
</compile_context>

<pallas_src>
import jax
import jax.numpy as jnp
from jax.experimental import pallas as pl
from jax.experimental.pallas import tpu as pltpu


# ----------------------------- Pallas kernel ------------------------------

def stconv_kernel(x_ref, a_ref, w_in_ref, b_sp_ref, m_ref, gamma_ref, beta_ref,
                  out_ref):
    # x_ref     : [N, C_in*T]         input, PyTorch layout (col = c*T + t)
    # a_ref     : [N, N]              normalized adjacency (with self loops)
    # w_in_ref  : [C_in*T, 2*C_out*T] fused (GCN-linear∘temporal-conv | residual 1x1)
    # b_sp_ref  : [1, C_out*T]        bg propagated through the conv band + bt
    # m_ref     : [C_out*T, C_out*T]  BN group-reduce+broadcast matrix, /(N*T) folded
    # gamma_ref : [1, C_out*T]        BatchNorm gamma tiled to final lanes
    # beta_ref  : [1, C_out*T]        BatchNorm beta + residual bias (final lanes)
    # out_ref   : [N, C_out*T]        final output layout (col = d*T + t)
    tc = out_ref.shape[1]                        # C_out * T

    # 1) ONE fused input matmul (128-lane output): left half = X @ (Wg ∘ ConvT),
    #    right half = residual 1x1 conv.  Both halves already channel-major.
    xw = jnp.dot(x_ref[...], w_in_ref[...], preferred_element_type=jnp.float32)
    resid = xw[:, tc:]                           # residual path (bias folded into beta)

    # 2) ONE adjacency aggregation for all timesteps; bias term carries the GCN
    #    bias pushed through the temporal band plus the temporal-conv bias.
    temp = jnp.dot(a_ref[...], xw[:, :tc],
                   preferred_element_type=jnp.float32) + b_sp_ref[...]

    # 3) BatchNorm1d (training mode), single pass: per-channel E[x], E[x^2]
    #    via one grouping/broadcast matmul (m_ref) + a sublane row reduction.
    m = m_ref[...]
    mean = jnp.sum(jnp.dot(temp, m, preferred_element_type=jnp.float32),
                   axis=0, keepdims=True)                       # [1, C_out*T]
    mean_sq = jnp.sum(jnp.dot(temp * temp, m, preferred_element_type=jnp.float32),
                      axis=0, keepdims=True)
    var = mean_sq - mean * mean                                 # biased variance

    # 4) fused BN affine + residual add + ReLU, lane-dense store in final layout
    scale = gamma_ref[...] * jax.lax.rsqrt(var + 1e-5)          # [1, C_out*T]
    shift = beta_ref[...] - mean * scale                        # includes resid bias
    out_ref[...] = jnp.maximum(temp * scale + shift + resid, 0.0)


# ------------------------------ glue / wrapper -----------------------------

def build_gcn_adjacency(edge_index, num_nodes):
    """D^{-1/2} (A + I) D^{-1/2} as a dense [N, N] matrix (GCNConv norm)."""
    src = jnp.concatenate([edge_index[0], jnp.arange(num_nodes)])
    dst = jnp.concatenate([edge_index[1], jnp.arange(num_nodes)])
    w = jnp.ones(src.shape[0], jnp.float32)
    deg = jnp.zeros(num_nodes, jnp.float32).at[dst].add(w)
    dinv = jnp.where(deg > 0, jax.lax.rsqrt(deg), 0.0)
    norm = dinv[src] * dinv[dst] * w
    # out[i] = sum over edges (j -> i) of norm * x[j]
    return jnp.zeros((num_nodes, num_nodes), jnp.float32).at[dst, src].add(norm)


def spatio_temporal_conv(x, edge_index, seq_len, params):
    """x: [num_nodes, C_in * seq_len] -> [num_nodes, C_out * seq_len]"""
    N = x.shape[0]
    T = seq_len
    c_in = x.shape[1] // T
    c_out = params["wg"].shape[1]
    K = params["wt"].shape[0]
    pad = (K - 1) // 2
    tc = c_out * T

    a_norm = build_gcn_adjacency(edge_index, N)

    # ---- wrapper-side layout plumbing on the (constant) weights: fold every
    # ---- reshape/transpose and the conv band into small block matrices so the
    # ---- kernel only does dense 2-D matmuls.
    eye_t = jnp.eye(T, dtype=jnp.float32)
    # GCN linear: rows (c, t) match input cols c*T+t; output cols t*C_out + d.
    wg_blk = jnp.einsum("cd,tu->ctud", params["wg"], eye_t).reshape(c_in * T, T * c_out)
    # Residual 1x1 conv: output cols already in final order d*T + t.
    wr_blk = jnp.einsum("cd,tu->ctdu", params["wr"], eye_t).reshape(c_in * T, tc)

    # Temporal conv (cross-correlation, zero pad) as a block-banded matrix:
    # w_temporal[t_in*C + i, o*T + t_out] = wt[t_in - t_out + pad, i, o] if valid.
    t_in = jnp.arange(T)[:, None]
    t_out = jnp.arange(T)[None, :]
    k_idx = t_in - t_out + pad
    valid = (k_idx >= 0) & (k_idx < K)
    band = jnp.where(valid[:, :, None, None],
                     params["wt"][jnp.clip(k_idx, 0, K - 1)], 0.0)   # [T,T,C,C]
    w_temporal = jnp.transpose(band, (0, 2, 3, 1)).reshape(T * c_out, tc)

    # Fuse GCN linear with the temporal conv (commutes with the A matmul);
    # push the GCN bias through the band so the padding boundary stays exact.
    w_main = wg_blk @ w_temporal                                 # [C_in*T, C_out*T]
    w_in = jnp.concatenate([w_main, wr_blk], axis=1)             # [C_in*T, 2*C_out*T]

    bg_wide = jnp.tile(params["bg"], (1, T))                     # [1, T*C_out] t-major
    bt_fin = jnp.repeat(params["bt"], T, axis=1)                 # [1, C_out*T] final
    b_sp = bg_wide @ w_temporal + bt_fin                         # bias inside BN input

    # BatchNorm per-channel group-sum + broadcast matrix with 1/(N*T) folded in.
    m_bn = (jnp.kron(jnp.eye(c_out, dtype=jnp.float32),
                     jnp.ones((T, T), jnp.float32)) / float(N * T))

    gamma_fin = jnp.repeat(params["gamma"], T, axis=1)
    # residual conv bias is a pure additive constant after BN -> fold into beta
    beta_fin = jnp.repeat(params["beta"] , T, axis=1) + jnp.repeat(params["br"], T, axis=1)

    args = (x, a_norm, w_in, b_sp, m_bn, gamma_fin, beta_fin)

    # Whole problem fits comfortably in VMEM at these shapes -> no grid.
    # For large N/T/C: tile node rows with a "parallel" grid axis (megacore),
    # keep A in HBM via BlockSpec(memory_space=pl.ANY) + pltpu.make_async_copy,
    # and cast matmul operands to bf16 on v6e/v7x (keep BN stats in f32).
    out = pl.pallas_call(
        stconv_kernel,
        out_shape=jax.ShapeDtypeStruct((N, tc), jnp.float32),
        in_specs=[pl.BlockSpec(memory_space=pltpu.MemorySpace.VMEM)] * len(args),
        out_specs=pl.BlockSpec(memory_space=pltpu.MemorySpace.VMEM),
    )(*args)

    # Kernel already wrote the final [N, C_out*T] (channel-major) layout.
    return out


# --------------------------- pure-JAX reference ----------------------------

def reference_forward(x, edge_index, seq_len, params):
    N = x.shape[0]
    c_in = x.shape[1] // seq_len
    a = build_gcn_adjacency(edge_index, N)
    x_r = x.reshape(N, c_in, seq_len)                      # [N, C_in, T]
    xw = jnp.einsum("nct,cd->ndt", x_r, params["wg"])
    spatial = jnp.einsum("mn,ndt->mdt", a, xw) + params["bg"].reshape(1, -1, 1)
    res = jnp.einsum("nct,cd->ndt", x_r, params["wr"]) + params["br"].reshape(1, -1, 1)
    # temporal conv
    K = params["wt"].shape[0]
    pad = (K - 1) // 2
    sp_pad = jnp.pad(spatial, ((0, 0), (0, 0), (pad, pad)))
    temporal = params["bt"].reshape(1, -1, 1) + sum(
        jnp.einsum("nct,cd->ndt", sp_pad[:, :, k:k + seq_len], params["wt"][k])
        for k in range(K))
    mean = jnp.mean(temporal, axis=(0, 2), keepdims=True)
    var = jnp.mean((temporal - mean) ** 2, axis=(0, 2), keepdims=True)
    normed = (temporal - mean) * jax.lax.rsqrt(var + 1e-5)
    normed = normed * params["gamma"].reshape(1, -1, 1) + params["beta"].reshape(1, -1, 1)
    return jnp.maximum(normed + res, 0.0).reshape(N, -1)


# ---------------------------------- main -----------------------------------

if __name__ == "__main__":
    num_nodes, c_in, c_out, seq_len, K = 16, 4, 8, 8, 3

    key = jax.random.PRNGKey(0)
    k_x, k_wg, k_bg, k_wt, k_bt, k_wr, k_br = jax.random.split(key, 7)

    # input features [num_nodes, in_channels * sequence_length]
    x = jax.random.normal(k_x, (num_nodes, c_in * seq_len), jnp.float32)

    # bidirectional ring graph -> edge_index [2, 32]
    src = jnp.concatenate([jnp.arange(num_nodes), (jnp.arange(num_nodes) + 1) % num_nodes])
    dst = jnp.concatenate([(jnp.arange(num_nodes) + 1) % num_nodes, jnp.arange(num_nodes)])
    edge_index = jnp.stack([src, dst], axis=0).astype(jnp.int32)

    # deterministic parameters (shapes implied by the PyTorch __init__)
    params = {
        "wg": 0.3 * jax.random.normal(k_wg, (c_in, c_out), jnp.float32),     # GCN linear
        "bg": 0.1 * jax.random.normal(k_bg, (1, c_out), jnp.float32),        # GCN bias
        "wt": 0.3 * jax.random.normal(k_wt, (K, c_out, c_out), jnp.float32), # Conv1d(k=3) taps [k, in, out]
        "bt": 0.1 * jax.random.normal(k_bt, (1, c_out), jnp.float32),
        "wr": 0.3 * jax.random.normal(k_wr, (c_in, c_out), jnp.float32),     # 1x1 residual conv
        "br": 0.1 * jax.random.normal(k_br, (1, c_out), jnp.float32),
        "gamma": jnp.ones((1, c_out), jnp.float32),                          # BatchNorm defaults
        "beta": jnp.zeros((1, c_out), jnp.float32),
    }

    out = spatio_temporal_conv(x, edge_index, seq_len, params)
    out = jax.block_until_ready(out)

    ref = reference_forward(x, edge_index, seq_len, params)
    assert out.shape == (num_nodes, c_out * seq_len), out.shape
    assert jnp.allclose(out, ref, rtol=1e-3, atol=1e-3), float(jnp.max(jnp.abs(out - ref)))

    print("KERNEL_OK")
</pallas_src>

<mosaic_0001>
module attributes {stable_mosaic.version = 11 : i64} {
  func.func @stconv_kernel(%arg0: memref<16x32xf32, #tpu.memory_space<vmem>>, %arg1: memref<16x16xf32, #tpu.memory_space<vmem>>, %arg2: memref<32x128xf32, #tpu.memory_space<vmem>>, %arg3: memref<1x64xf32, #tpu.memory_space<vmem>>, %arg4: memref<64x64xf32, #tpu.memory_space<vmem>>, %arg5: memref<1x64xf32, #tpu.memory_space<vmem>>, %arg6: memref<1x64xf32, #tpu.memory_space<vmem>>, %arg7: memref<16x64xf32, #tpu.memory_space<vmem>>) attributes {dimension_semantics = [], scalar_prefetch = 0 : i64, scratch_operands = 0 : i64, tpu.core_type = #tpu.core_type<tc>} {
    %c0 = arith.constant 0 : index
    %c0_0 = arith.constant 0 : index
    %0 = vector.load %arg0[%c0, %c0_0] : memref<16x32xf32, #tpu.memory_space<vmem>>, vector<16x32xf32>
    %c0_1 = arith.constant 0 : index
    %c0_2 = arith.constant 0 : index
    %1 = vector.load %arg2[%c0_1, %c0_2] : memref<32x128xf32, #tpu.memory_space<vmem>>, vector<32x128xf32>
    %cst = arith.constant dense<0.000000e+00> : vector<16x128xf32>
    %2 = tpu.matmul %0, %1, %cst {dimension_numbers = #tpu.dot_dimension_numbers<[1], [0], [0], [1], [0, 0, 1, 1], [], []>} : vector<16x32xf32>, vector<32x128xf32>, vector<16x128xf32> -> vector<16x128xf32>
    %3 = vector.extract_strided_slice %2 {offsets = [0, 64], sizes = [16, 64], strides = [1, 1]} : vector<16x128xf32> to vector<16x64xf32>
    %c0_3 = arith.constant 0 : index
    %c0_4 = arith.constant 0 : index
    %4 = vector.load %arg1[%c0_3, %c0_4] : memref<16x16xf32, #tpu.memory_space<vmem>>, vector<16x16xf32>
    %5 = vector.extract_strided_slice %2 {offsets = [0, 0], sizes = [16, 64], strides = [1, 1]} : vector<16x128xf32> to vector<16x64xf32>
    %cst_5 = arith.constant dense<0.000000e+00> : vector<16x64xf32>
    %6 = tpu.matmul %4, %5, %cst_5 {dimension_numbers = #tpu.dot_dimension_numbers<[1], [0], [0], [1], [0, 0, 1, 1], [], []>} : vector<16x16xf32>, vector<16x64xf32>, vector<16x64xf32> -> vector<16x64xf32>
    %c0_6 = arith.constant 0 : index
    %c0_7 = arith.constant 0 : index
    %7 = vector.load %arg3[%c0_6, %c0_7] : memref<1x64xf32, #tpu.memory_space<vmem>>, vector<1x64xf32>
    %8 = vector.broadcast %7 : vector<1x64xf32> to vector<16x64xf32>
    %9 = arith.addf %6, %8 : vector<16x64xf32>
    %c0_8 = arith.constant 0 : index
    %c0_9 = arith.constant 0 : index
    %10 = vector.load %arg4[%c0_8, %c0_9] : memref<64x64xf32, #tpu.memory_space<vmem>>, vector<64x64xf32>
    %cst_10 = arith.constant dense<0.000000e+00> : vector<16x64xf32>
    %11 = tpu.matmul %9, %10, %cst_10 {dimension_numbers = #tpu.dot_dimension_numbers<[1], [0], [0], [1], [0, 0, 1, 1], [], []>} : vector<16x64xf32>, vector<64x64xf32>, vector<16x64xf32> -> vector<16x64xf32>
    %cst_11 = arith.constant dense<0.000000e+00> : vector<64xf32>
    %12 = vector.multi_reduction <add>, %11, %cst_11 [0] : vector<16x64xf32> to vector<64xf32>
    %13 = vector.shape_cast %12 : vector<64xf32> to vector<1x64xf32>
    %14 = arith.mulf %9, %9 : vector<16x64xf32>
    %cst_12 = arith.constant dense<0.000000e+00> : vector<16x64xf32>
    %15 = tpu.matmul %14, %10, %cst_12 {dimension_numbers = #tpu.dot_dimension_numbers<[1], [0], [0], [1], [0, 0, 1, 1], [], []>} : vector<16x64xf32>, vector<64x64xf32>, vector<16x64xf32> -> vector<16x64xf32>
    %cst_13 = arith.constant dense<0.000000e+00> : vector<64xf32>
    %16 = vector.multi_reduction <add>, %15, %cst_13 [0] : vector<16x64xf32> to vector<64xf32>
    %17 = vector.shape_cast %16 : vector<64xf32> to vector<1x64xf32>
    %18 = arith.mulf %13, %13 : vector<1x64xf32>
    %19 = arith.subf %17, %18 : vector<1x64xf32>
    %c0_14 = arith.constant 0 : index
    %c0_15 = arith.constant 0 : index
    %20 = vector.load %arg5[%c0_14, %c0_15] : memref<1x64xf32, #tpu.memory_space<vmem>>, vector<1x64xf32>
    %cst_16 = arith.constant 9.99999974E-6 : f32
    %21 = vector.broadcast %cst_16 : f32 to vector<1x64xf32>
    %22 = arith.addf %19, %21 : vector<1x64xf32>
    %23 = math.rsqrt %22 : vector<1x64xf32>
    %24 = arith.mulf %20, %23 : vector<1x64xf32>
    %c0_17 = arith.constant 0 : index
    %c0_18 = arith.constant 0 : index
    %25 = vector.load %arg6[%c0_17, %c0_18] : memref<1x64xf32, #tpu.memory_space<vmem>>, vector<1x64xf32>
    %26 = arith.mulf %13, %24 : vector<1x64xf32>
    %27 = arith.subf %25, %26 : vector<1x64xf32>
    %28 = vector.broadcast %24 : vector<1x64xf32> to vector<16x64xf32>
    %29 = arith.mulf %9, %28 : vector<16x64xf32>
    %30 = vector.broadcast %27 : vector<1x64xf32> to vector<16x64xf32>
    %31 = arith.addf %29, %30 : vector<16x64xf32>
    %32 = arith.addf %31, %3 : vector<16x64xf32>
    %cst_19 = arith.constant 0.000000e+00 : f32
    %33 = vector.broadcast %cst_19 : f32 to vector<16x64xf32>
    %34 = arith.maximumf %32, %33 : vector<16x64xf32>
    %c0_20 = arith.constant 0 : index
    %c0_21 = arith.constant 0 : index
    %35 = vector.load %arg7[%c0_20, %c0_21] : memref<16x64xf32, #tpu.memory_space<vmem>>, vector<16x64xf32>
    tpu.vector_store %arg7[%c0_20, %c0_21], %34 {strides = array<i32>} : memref<16x64xf32, #tpu.memory_space<vmem>>, vector<16x64xf32>,
    return
  }
}

</mosaic_0001>

<bundles_post_ra>
// kernel: tpu_custom_call.1
= control target key start
LH: loop header
LB: loop body
LE: loop exit
PB: predicated region body
PF: predicated region fallthrough
CT: control target
= control target key end

     0   :  { %12 = vsyncpa [#allocation3], 0  ;;  %s564_s0 = inlined_call_operand.hbm [shape: f32[16,32], index: 0, kind: input, shape index: {}]   ;;  %s565_s1 = inlined_call_operand.hbm [shape: f32[16,16], index: 1, kind: input, shape index: {}]   ;;  %s566_s2 = inlined_call_operand.hbm [shape: f32[32,128], index: 2, kind: input, shape index: {}]   ;;  %s567_s3 = inlined_call_operand.vmem [shape: f32[1,64], index: 3, kind: input, shape index: {}]   ;;  %s568_s4 = inlined_call_operand.hbm [shape: f32[64,64], index: 4, kind: input, shape index: {}]   ;;  %s569_s5 = inlined_call_operand.vmem [shape: f32[1,64], index: 5, kind: input, shape index: {}]   ;;  %s570_s6 = inlined_call_operand.vmem [shape: f32[1,64], index: 6, kind: input, shape index: {}]   ;;  %s571_s7 = inlined_call_operand.hbm [shape: f32[16,64], index: 7, kind: output, shape index: {}]  }
   0x1   :  { %13 = vsyncpa [#allocation6], 0 }
   0x2   :  { %14 = vsyncpa [#allocation9], 0 }
   0x3   :  { %15 = vsyncpa [#allocation4], 0  ;;  %s33_s26 = sshll.u32 %s565_s1, 4  ;;  %s467_s27 = smov [#allocation5]   ;;  %s34_s26 = int_to_ptr.hbm [resolvable:$true] %s33_s26 }
   0x4   :  { %s35_s28 = sshll.u32 %s467_s27, 4  ;;  %s20_s8 = sshll.u32 %s564_s0, 4  ;;  %s36_s28 = int_to_ptr.vmem [resolvable:$true] %s35_s28  ;;  %s21_s8 = int_to_ptr.hbm [resolvable:$true] %s20_s8 }
   0x5   :  { %s468_s9 = smov 128   ;;  %s469_s10 = smov 8  }
   0x6   :  { %41 = dma.hbm_to_vmem [thread:$0]  %s34_s26, 256, %s36_s28, [#allocation6], %s468_s9, %s468_s9, %s469_s10  }
   0x7   :  { %s470_s11 = smov [#allocation2]   ;;  %s46_s1 = sshll.u32 %s566_s2, 4  ;;  %s47_s1 = int_to_ptr.hbm [resolvable:$true] %s46_s1 }
   0x8   :  { %s22_s12 = sshll.u32 %s470_s11, 4  ;;  %s61_s16 = sshll.u32 %s568_s4, 4  ;;  %s23_s12 = int_to_ptr.vmem [resolvable:$true] %s22_s12  ;;  %s62_s16 = int_to_ptr.hbm [resolvable:$true] %s61_s16 }
   0x9   :  { %28 = dma.hbm_to_vmem [thread:$0]  %s21_s8, 256, %s23_s12, [#allocation3], %s468_s9, %s468_s9, %s469_s10  }
   0xa   :  { %s471_s17 = smov [#allocation7]   ;;  %s472_s19 = smov [#allocation8]  }
   0xb   :  { %s48_s18 = sshll.u32 %s471_s17, 4  ;;  %s63_s2 = sshll.u32 %s472_s19, 4  ;;  %s49_s18 = int_to_ptr.vmem [resolvable:$true] %s48_s18  ;;  %s64_s2 = int_to_ptr.vmem [resolvable:$true] %s63_s2 }
   0xc   :  { %54 = dma.hbm_to_vmem [thread:$0]  %s47_s1, 512, %s49_s18, [#allocation6], %s468_s9, %s468_s9, %s469_s10  }
   0xd   :  { %69 = dma.hbm_to_vmem [thread:$0]  %s62_s16, 1024, %s64_s2, [#allocation9], %s468_s9, %s468_s9, %s469_s10  }
   0xe   :  { %459 = dma.done.wait [#allocation3], 256  }
   0xf   :  { %460 = vsyncadd [#allocation3], 4294967040 }
  0x10   :  { %461 = dma.done.wait [#allocation6], 768  }
  0x11   :  { %462 = vsyncadd [#allocation6], 4294966528 }
  0x12   :  { %463 = dma.done.wait [#allocation9], 1024  }
  0x13   :  { %464 = vsyncadd [#allocation9], 4294966272  ;;  %v95_v0 = vld [vmem:[#allocation7 + $0x18] sm:$0xff]  ;;  %v94_v1 = vld [vmem:[#allocation7 + $0x10] sm:$0xff]  ;;  %vm96_vm0 = vcmask 261120   ;;  %s473_s4 = smov 64  }
  0x14   :  { %115 = vmatpush.msra.mxu0 %v95_v0  ;;  %v93_v2 = vld [vmem:[#allocation7 + $0x8] sm:$0xff]  ;;  %v92_v3 = vld [vmem:[#allocation7] sm:$0xff]  ;;  %v126_v8 = vld [vmem:[#allocation5] sm:$0xff]  ;;  %vm132_vm1 = vcmask 130048   ;;  %vm170_vm2 = vcmask 523264   ;;  %s297_s28 = sshll.u32 %s571_s7, 4  ;;  %s298_s28 = int_to_ptr.hbm [resolvable:$true] %s297_s28 }
  0x15   :  { %v90_v4 = vld [vmem:[#allocation2] sm:$0xff]  ;;  %v91_v5 = vld [vmem:[#allocation2 + $0x8] sm:$0xff]  ;;  %v127_v9 = vld [vmem:[#allocation5 + $0x8] sm:$0xff] }
  0x16   :  { %116 = vmatpush.msra.mxu0 %v94_v1  ;;  %v169_v10 = vld [vmem:[#allocation8 + $0x38] sm:$0xff]  ;;  %v168_v11 = vld [vmem:[#allocation8 + $0x30] sm:$0xff]  ;;  %v167_v12 = vld [vmem:[#allocation8 + $0x28] sm:$0xff] }
  0x17   :  { %225 = vmatpush.msra.mxu3 %v169_v10  ;;  %320 = vmatpush.msra.mxu2 %v169_v10  ;;  %v166_v13 = vld [vmem:[#allocation8 + $0x20] sm:$0xff]  ;;  %v165_v14 = vld [vmem:[#allocation8 + $0x18] sm:$0xff]  ;;  %v164_v15 = vld [vmem:[#allocation8 + $0x10] sm:$0xff] }
  0x18   :  { %117 = vmatpush.msra.mxu0 %v93_v2  ;;  %v163_v16 = vld [vmem:[#allocation8 + $0x8] sm:$0xff]  ;;  %v162_v17 = vld [vmem:[#allocation8] sm:$0xff] }
  0x19   :  { %226 = vmatpush.msra.mxu3 %v168_v11  ;;  %321 = vmatpush.msra.mxu2 %v168_v11  ;;  %v336_v18 = vld [vmem:[%s567_s3] ss:$0 sm:$0xff] }
  0x1a   :  { %118 = vmatpush.msra.mxu0 %v92_v3  ;;  %v251_v56 = vld [vmem:[%s569_s5] sm:$0x1]  ;;  %s474_s5 = smov [#allocation10]  }
  0x1b   :  { %312 = vmatmul.msk.f32.vlgmr.msra.gmra.mxu0 %vm96_vm0, %v90_v4  ;;  %227 = vmatpush.msra.mxu3 %v167_v12  ;;  %v264_v60 = vld [vmem:[%s570_s6] sm:$0x1]  ;;  %s295_s25 = sshll.u32 %s474_s5, 4  ;;  %s296_s25 = int_to_ptr.vmem [resolvable:$true] %s295_s25 }
  0x1c   :  { %322 = vmatpush.msra.mxu2 %v167_v12 }
  0x1d   :  { %228 = vmatpush.msra.mxu3 %v166_v13 }
  0x1e   :  { %323 = vmatpush.msra.mxu2 %v166_v13 }
  0x1f   :  { %229 = vmatpush.msra.mxu3 %v165_v14 }
  0x20   :  { %324 = vmatpush.msra.mxu2 %v165_v14 }
  0x21   :  { %230 = vmatpush.msra.mxu3 %v164_v15 }
  0x22   :  { %325 = vmatpush.msra.mxu2 %v164_v15 }
  0x23   :  { %313 = vmatmul.msk.f32.gmra.mxu0 %vm96_vm0, %v91_v5  ;;  %231 = vmatpush.msra.mxu3 %v163_v16 }
  0x24   :  { %326 = vmatpush.msra.mxu2 %v163_v16 }
  0x25   :  { %232 = vmatpush.msra.mxu3 %v162_v17 }
  0x26   :  { %327 = vmatpush.msra.mxu2 %v162_v17 }
  0x98   :  { %v120_v6 = vpop.f32.mrf.mxu0 }
  0x99   :  { %279 = vrot.lane.b32.xlu0 %v120_v6, %s473_s4 }
  0xa0   :  { %v123_v7 = vpop.f32.mrf.mxu0 }
  0xa1   :  { %281 = vrot.lane.b32.xlu0 %v123_v7, %s473_s4  ;;  %153 = vmatpush.msra.mxu1 %v123_v7 }
  0xa3   :  { %154 = vmatpush.msra.mxu1 %v120_v6 }
  0xa4   :  { %314 = vmatmul.msk.f32.vlgmr.msra.gmra.mxu1 %vm132_vm1, %v126_v8 }
  0xa5   :  { %185 = vmatpush.msrb.mxu1 %v169_v10 }
  0xa7   :  { %186 = vmatpush.msrb.mxu1 %v168_v11 }
  0xa9   :  { %187 = vmatpush.msrb.mxu1 %v167_v12 }
  0xab   :  { %188 = vmatpush.msrb.mxu1 %v166_v13 }
  0xac   :  { %315 = vmatmul.msk.f32.gmra.mxu1 %vm132_vm1, %v127_v9 }
  0xad   :  { %189 = vmatpush.msrb.mxu1 %v165_v14 }
  0xaf   :  { %190 = vmatpush.msrb.mxu1 %v164_v15 }
  0xb1   :  { %191 = vmatpush.msrb.mxu1 %v163_v16 }
  0xb3   :  { %192 = vmatpush.msrb.mxu1 %v162_v17 }
 0x10b   :  { %v280_v57 = vpop.permute.xlu0 %279 }
 0x113   :  { %v282_v5 = vpop.permute.xlu0 %281 }
 0x121   :  { %v156_v19 = vpop.f32.mrf.mxu1 }
 0x122   :  { %v157_v20 = vadd.f32 %v336_v18, %v156_v19 }
 0x124   :  { %316 = vmatmul.msk.f32.vlgmr.msrb.gmra.mxu1 %vm170_vm2, %v157_v20  ;;  %v209_v21 = vmul.f32 %v157_v20, %v157_v20 }
 0x126   :  { %318 = vmatmul.msk.f32.vlgmr.msra.gmra.mxu3 %vm170_vm2, %v209_v21 }
 0x129   :  { %v159_v22 = vpop.f32.mrf.mxu1 }
 0x12a   :  { %v160_v23 = vadd.f32 %v336_v18, %v159_v22 }
 0x12c   :  { %317 = vmatmul.msk.f32.vlgmr.msra.gmra.mxu2 %vm170_vm2, %v160_v23  ;;  %v210_v24 = vmul.f32 %v160_v23, %v160_v23 }
 0x12e   :  { %319 = vmatmul.msk.f32.gmra.mxu3 %vm170_vm2, %v210_v24 }
 0x1a1   :  { %v194_v26 = vpop.f32.mrf.mxu1 }
 0x1a2   :  { %v200_v28 = vsel %vm170_vm2, %v194_v26, 0.0 }
 0x1a9   :  { %v234_v25 = vpop.f32.mrf.mxu3 }
 0x1aa   :  { %v240_v32 = vsel %vm170_vm2, %v234_v25, 0.0 }
 0x1af   :  { %v197_v27 = vpop.f32.mrf.mxu2 }
 0x1b0   :  { %v201_v29 = vsel %vm170_vm2, %v197_v27, 0.0 }
 0x1b1   :  { %v202_v30 = vadd.f32 %v201_v29, %v200_v28  ;;  %v237_v31 = vpop.f32.mrf.mxu3 }
 0x1b2   :  { %v241_v33 = vsel %vm170_vm2, %v237_v31, 0.0 }
 0x1b3   :  { %v203_v34 = vrot.slane %v202_v30, 4  ;;  %v242_v35 = vadd.f32 %v241_v33, %v240_v32 }
 0x1b5   :  { %v204_v36 = vadd.f32 %v203_v34, %v202_v30  ;;  %v243_v37 = vrot.slane %v242_v35, 4 }
 0x1b7   :  { %v205_v38 = vrot.slane %v204_v36, 2  ;;  %v244_v39 = vadd.f32 %v243_v37, %v242_v35 }
 0x1b9   :  { %v206_v40 = vadd.f32 %v205_v38, %v204_v36  ;;  %v245_v41 = vrot.slane %v244_v39, 2 }
 0x1bb   :  { %v207_v42 = vrot.slane %v206_v40, 1  ;;  %v246_v43 = vadd.f32 %v245_v41, %v244_v39 }
 0x1bd   :  { %v208_v44 = vadd.f32 %v207_v42, %v206_v40  ;;  %v247_v45 = vrot.slane %v246_v43, 1 }
 0x1bf   :  { %v249_v46 = vmul.f32 %v208_v44, %v208_v44  ;;  %v248_v47 = vadd.f32 %v247_v45, %v246_v43 }
 0x1c1   :  { %v250_v48 = vsub.f32 %v248_v47, %v249_v46 }
 0x1c3   :  { %v252_v49 = vadd.f32 1e-05, %v250_v48 }
 0x1c5   :  { %337 = vrsqrt.f32 %v252_v49  ;;  %vm259_vm4 = vweird.f32 %v252_v49 }
 0x1cb   :  { %v338_v50 = vpop.eup %337 }
 0x1cc   :  { %v254_v51 = vmul.f32 %v338_v50, %v252_v49  ;;  %vm260_vm3 = vweird.f32 %v338_v50 }
 0x1cd   :  { %vm261_vm5 = vmor %vm259_vm4, %vm260_vm3 }
 0x1ce   :  { %v255_v52 = vmul.f32 %v338_v50, %v254_v51 }
 0x1d0   :  { %v256_v53 = vmul.f32 0.5, %v255_v52 }
 0x1d2   :  { %v257_v54 = vsub.f32 1.5, %v256_v53 }
 0x1d4   :  { %v258_v55 = vmul.f32 %v338_v50, %v257_v54 }
 0x1d6   :  { %v262_v58 = vsel %vm261_vm5, %v338_v50, %v258_v55 }
 0x1d7   :  { %v263_v59 = vmul.f32 %v262_v58, %v251_v56 }
 0x1d9   :  { %v265_v61 = vmul.f32 %v263_v59, %v208_v44  ;;  %v268_v62 = vperm.slane %v263_v59, 0 }
 0x1db   :  { %v266_v63 = vsub.f32 %v264_v60, %v265_v61  ;;  %v270_v0 = vmul.f32 %v268_v62, %v157_v20  ;;  %v271_v1 = vmul.f32 %v268_v62, %v160_v23 }
 0x1dd   :  { %v273_v2 = vperm.slane %v266_v63, 0 }
 0x1df   :  { %v275_v3 = vadd.f32 %v273_v2, %v270_v0  ;;  %v276_v4 = vadd.f32 %v273_v2, %v271_v1 }
 0x1e1   :  { %v285_v6 = vadd.f32 %v280_v57, %v275_v3  ;;  %v286_v7 = vadd.f32 %v282_v5, %v276_v4 }
 0x1e3   :  { %v287_v8 = vmax.f32 %v285_v6, 0.0  ;;  %v288_v9 = vmax.f32 %v286_v7, 0.0 }
 0x1e5   :  { %289 = vst.msk [vmem:[#allocation10] sm:$0xff] %vm170_vm2, %v287_v8 }
 0x1e6   :  { %290 = vst.msk [vmem:[#allocation10 + $0x8] sm:$0xff] %vm170_vm2, %v288_v9 }
 0x1e7   :  { %303 = dma.vmem_to_hbm [thread:$0]  %s296_s25, 256, %s298_s28, [#allocation4], %s468_s9, %s468_s9, %s469_s10  }
 0x1e8   :  { %465 = dma.done.wait [#allocation4], 256  }
 0x1e9   :  { %466 = vsyncadd [#allocation4], 4294967040 }
 0x1ea   :  { %308 = vsyncpa [#allocation3], 1 }
 0x1eb   :  { %309 = vsyncpa [#allocation6], 1 }
 0x1ec   :  { %310 = vsyncpa [#allocation9], 1 }
 0x1ed   :  { %311 = vsyncpa [#allocation4], 1 }

</bundles_post_ra>
